<compile_context>
chip_gen: v5e
topology: v5e:2x2
jax: 0.10.0
libtpu: 0.0.40
codegen_flags: <defaults>
</compile_context>

<pallas_src>
import functools
import math

import jax
import jax.numpy as jnp
from jax.experimental import pallas as pl
from jax.experimental.pallas import tpu as pltpu

_VMEM_LIMIT = 64 * 1024 * 1024  # explicit scoped-VMEM cap (review item)


# ----------------------------- tiled matmul kernels ------------------------- #

def _matmul_kernel(x_ref, w_ref, o_ref, acc_ref):
    @pl.when(pl.program_id(2) == 0)
    def _():
        acc_ref[...] = jnp.zeros_like(acc_ref)

    acc_ref[...] += jnp.dot(x_ref[...], w_ref[...],
                            preferred_element_type=jnp.float32)

    @pl.when(pl.program_id(2) == pl.num_programs(2) - 1)
    def _():
        o_ref[...] = acc_ref[...].astype(o_ref.dtype)


def _matmul_bias_kernel(x_ref, w_ref, b_ref, o_ref, acc_ref):
    @pl.when(pl.program_id(2) == 0)
    def _():
        acc_ref[...] = jnp.zeros_like(acc_ref)

    acc_ref[...] += jnp.dot(x_ref[...], w_ref[...],
                            preferred_element_type=jnp.float32)

    @pl.when(pl.program_id(2) == pl.num_programs(2) - 1)
    def _():
        o_ref[...] = (acc_ref[...] + b_ref[...].astype(jnp.float32)).astype(o_ref.dtype)


def _pick_tile(size, candidates):
    # Largest candidate that exactly divides `size`; otherwise use the full extent
    # (full-extent blocks always satisfy the (8,128) BlockSpec constraint).
    for c in candidates:
        if size >= c and size % c == 0:
            return c
    return size


def pallas_matmul(x, w, bias=None):
    """y = x @ w (+ bias). x:(M,K) w:(K,N) bias:(N,) or None."""
    M, K = x.shape
    _, N = w.shape
    tm = _pick_tile(M, (512, 256, 128, 64, 32, 16, 8))
    tn = _pick_tile(N, (512, 256, 128))
    tk = _pick_tile(K, (512, 256, 128))
    grid = (M // tm, N // tn, K // tk)

    in_specs = [
        pl.BlockSpec((tm, tk), lambda i, j, kk: (i, kk)),
        pl.BlockSpec((tk, tn), lambda i, j, kk: (kk, j)),
    ]
    args = [x, w]
    if bias is not None:
        in_specs.append(pl.BlockSpec((1, tn), lambda i, j, kk: (0, j)))
        args.append(bias.reshape(1, N))
        kernel = _matmul_bias_kernel
    else:
        kernel = _matmul_kernel

    itemsize = x.dtype.itemsize
    cost = pl.CostEstimate(
        flops=int(2 * M * N * K),
        transcendentals=0,
        bytes_accessed=int(itemsize * (M * K + K * N + M * N)),
    )

    return pl.pallas_call(
        kernel,
        out_shape=jax.ShapeDtypeStruct((M, N), x.dtype),
        grid_spec=pltpu.PrefetchScalarGridSpec(
            num_scalar_prefetch=0,
            grid=grid,
            in_specs=in_specs,
            out_specs=pl.BlockSpec((tm, tn), lambda i, j, kk: (i, j)),
            scratch_shapes=[pltpu.VMEM((tm, tn), jnp.float32)],
        ),
        compiler_params=pltpu.CompilerParams(
            dimension_semantics=("parallel", "parallel", "arbitrary"),
            vmem_limit_bytes=_VMEM_LIMIT,
        ),
        cost_estimate=cost,
    )(*args)


# --------------------------- performer (FAVOR+) kernel ---------------------- #

def _performer_kernel(q_ref, k_ref, v_ref, pT_ref, o_ref, *, nb_features):
    # Block shapes: q/k/v/o = (G, n, d), pT = (d, m_pad). Each grid step handles
    # G (batch, head) slices; feature-map matmuls are flattened to (G*n, d) rows.
    G, n, d = q_ref.shape
    m_pad = pT_ref.shape[-1]
    data_normalizer = d ** -0.25
    ratio = nb_features ** -0.5          # ratio uses the REAL feature count
    eps = 1e-4

    q = q_ref[...].astype(jnp.float32).reshape(G * n, d)
    k = k_ref[...].astype(jnp.float32).reshape(G * n, d)
    projT = pT_ref[...].astype(jnp.float32)

    # FAVOR+ softmax-kernel feature maps (contraction flattened over G*n rows).
    qd = jnp.dot(q * data_normalizer, projT, preferred_element_type=jnp.float32)
    kd = jnp.dot(k * data_normalizer, projT, preferred_element_type=jnp.float32)
    diag_q = jnp.sum(q * q, axis=-1, keepdims=True) * (0.5 * data_normalizer * data_normalizer)
    diag_k = jnp.sum(k * k, axis=-1, keepdims=True) * (0.5 * data_normalizer * data_normalizer)

    qd3 = qd.reshape(G, n, m_pad)
    kd3 = kd.reshape(G, n, m_pad)
    dq3 = diag_q.reshape(G, n, 1)
    dk3 = diag_k.reshape(G, n, 1)

    padded = nb_features != m_pad
    if padded:
        feat_mask = jax.lax.broadcasted_iota(jnp.int32, (1, 1, m_pad), 2) < nb_features
        qd3 = jnp.where(feat_mask, qd3, -1e30)
        kd3 = jnp.where(feat_mask, kd3, -1e30)

    q_max = jnp.max(qd3, axis=-1, keepdims=True)                       # per-query row
    k_max = jnp.max(jnp.max(kd3, axis=-1, keepdims=True), axis=1,
                    keepdims=True)                                      # per (batch, head)
    q_prime = ratio * (jnp.exp(qd3 - dq3 - q_max) + eps)
    k_prime = ratio * (jnp.exp(kd3 - dk3 - k_max) + eps)
    if padded:
        q_prime = jnp.where(feat_mask, q_prime, 0.0)                   # padded lanes -> 0
        k_prime = jnp.where(feat_mask, k_prime, 0.0)

    # Non-causal linear attention, per (batch, head) slice (static unroll over G).
    for g in range(G):
        qp = q_prime[g]                                   # (n, m_pad)
        kp = k_prime[g]                                   # (n, m_pad)
        vg = v_ref[g].astype(jnp.float32)                 # (n, d)

        k_sum = jnp.sum(kp, axis=0, keepdims=True)                        # (1, m_pad)
        denom = jnp.sum(qp * k_sum, axis=-1, keepdims=True)               # (n, 1)
        d_inv = pl.reciprocal(denom, approx=True)                         # EUP slot

        context = jax.lax.dot_general(kp, vg, (((0,), (0,)), ((), ())),
                                      preferred_element_type=jnp.float32)  # (m_pad, d)
        out_g = jnp.dot(qp, context, preferred_element_type=jnp.float32) * d_inv
        o_ref[g] = out_g.astype(o_ref.dtype)


def _pick_group(BH, n, d, m_pad, budget_bytes=8 * 1024 * 1024):
    # Largest divisor of BH whose per-step footprint (double-buffered q/k/v/out
    # blocks + f32 (G*n, m_pad) intermediates) stays well inside the v7x budget.
    best = 1
    for g in range(1, BH + 1):
        if BH % g:
            continue
        blocks = 2 * 4 * g * n * d * 4
        inter = 6 * g * n * m_pad * 4
        if blocks + inter <= budget_bytes:
            best = g
    return best


def performer_attention(q, k, v, proj):
    """q, k, v: (BH, n, d).  proj: (m, d) FAVOR+ projection matrix."""
    BH, n, d = q.shape
    m = proj.shape[0]
    m_pad = ((m + 127) // 128) * 128                      # lane-dense feature dim
    projT = jnp.zeros((d, m_pad), q.dtype).at[:, :m].set(proj.T.astype(q.dtype))

    G = _pick_group(BH, n, d, m_pad)
    grid = (BH // G,)
    kernel = functools.partial(_performer_kernel, nb_features=m)

    cost = pl.CostEstimate(
        flops=int(8 * BH * n * d * m_pad),
        transcendentals=int(2 * BH * n * m_pad),
        bytes_accessed=int(4 * (4 * BH * n * d + d * m_pad)),
    )

    return pl.pallas_call(
        kernel,
        out_shape=jax.ShapeDtypeStruct((BH, n, d), q.dtype),
        grid_spec=pltpu.PrefetchScalarGridSpec(
            num_scalar_prefetch=0,
            grid=grid,
            in_specs=[
                pl.BlockSpec((G, n, d), lambda i: (i, 0, 0)),
                pl.BlockSpec((G, n, d), lambda i: (i, 0, 0)),
                pl.BlockSpec((G, n, d), lambda i: (i, 0, 0)),
                pl.BlockSpec((d, m_pad), lambda i: (0, 0)),
            ],
            out_specs=pl.BlockSpec((G, n, d), lambda i: (i, 0, 0)),
        ),
        compiler_params=pltpu.CompilerParams(
            dimension_semantics=("parallel",),
            vmem_limit_bytes=_VMEM_LIMIT,
        ),
        cost_estimate=cost,
    )(q, k, v, projT)
    # TODO(synk): for very long sequences, additionally tile the n axis (k_cumsum /
    # context accumulation pass + q pass) so per-step VMEM stays bounded on v7x.


# ------------------------------- parameter setup ----------------------------- #

def gaussian_orthogonal_random_matrix(key, nb_rows, nb_cols):
    # Mirrors performer_pytorch gaussian_orthogonal_random_matrix (scaling=0).
    nb_full = nb_rows // nb_cols
    keys = jax.random.split(key, nb_full + 2)
    blocks = []
    for i in range(nb_full):
        g = jax.random.normal(keys[i], (nb_cols, nb_cols), jnp.float32)
        q_, _ = jnp.linalg.qr(g)
        blocks.append(q_.T)
    rem = nb_rows - nb_full * nb_cols
    if rem > 0:
        g = jax.random.normal(keys[nb_full], (nb_cols, nb_cols), jnp.float32)
        q_, _ = jnp.linalg.qr(g)
        blocks.append(q_.T[:rem])
    mat = jnp.concatenate(blocks, axis=0)
    multiplier = jnp.linalg.norm(
        jax.random.normal(keys[-1], (nb_rows, nb_cols), jnp.float32), axis=-1)
    return multiplier[:, None] * mat  # (nb_rows, nb_cols)


def init_params(key, dim, heads, dim_head, nb_features):
    inner = heads * dim_head
    kq, kk, kv, ko, kb, kp = jax.random.split(key, 6)
    scale = 0.02
    wq = scale * jax.random.normal(kq, (dim, inner), jnp.float32)
    wk = scale * jax.random.normal(kk, (dim, inner), jnp.float32)
    wv = scale * jax.random.normal(kv, (dim, inner), jnp.float32)
    return {
        "heads": heads,
        "dim_head": dim_head,
        # fused QKV weight stored transposed (in, 3*inner): columns [q | k | v]
        "Wqkv": jnp.concatenate([wq, wk, wv], axis=1),
        "Wo": scale * jax.random.normal(ko, (inner, dim), jnp.float32),
        "bo": scale * jax.random.normal(kb, (dim,), jnp.float32),
        "proj": gaussian_orthogonal_random_matrix(kp, nb_features, dim_head),
    }


# --------------------------------- forward pass ------------------------------ #

def n_attention_forward(x, params):
    # nAttention.forward with pos_emb=None, context=None, mask=None,
    # output_attentions=False, dropout=0.0 (identity).
    b, n, dim = x.shape
    h, dh = params["heads"], params["dim_head"]
    inner = h * dh

    xf = x.reshape(b * n, dim)
    qkv = pallas_matmul(xf, params["Wqkv"])               # (b*n, 3*inner), qkv_bias=False

    # 'b n (qkv h d) -> qkv (b h) n d'
    qkv = qkv.reshape(b, n, 3, h, dh).transpose(2, 0, 3, 1, 4)
    q = qkv[0].reshape(b * h, n, dh)
    k = qkv[1].reshape(b * h, n, dh)
    v = qkv[2].reshape(b * h, n, dh)

    out = performer_attention(q, k, v, params["proj"])    # (b*h, n, dh)

    # 'b h n d -> b n (h d)'
    out = out.reshape(b, h, n, dh).transpose(0, 2, 1, 3).reshape(b * n, inner)
    out = pallas_matmul(out, params["Wo"], params["bo"])  # attn_out_bias=True
    return out.reshape(b, n, dim)
    # TODO(synk): output_attentions=True path (per-head attention weights against an
    # identity V) is not implemented; forward returns the main output only.


# ----------------------------------- driver ---------------------------------- #

if __name__ == "__main__":
    key = jax.random.PRNGKey(0)
    kx, kp = jax.random.split(key)

    b, n, dim = 2, 16, 32
    heads, dim_head = 4, 8
    nb_features = int(dim_head * math.log(dim_head))  # performer default -> 16

    params = init_params(kp, dim, heads, dim_head, nb_features)
    x = jax.random.normal(kx, (b, n, dim), jnp.float32)

    out = n_attention_forward(x, params)
    jax.block_until_ready(out)
    assert out.shape == (b, n, dim)
    assert bool(jnp.all(jnp.isfinite(out)))
    print("KERNEL_OK")
</pallas_src>

<mosaic_0001>
module attributes {stable_mosaic.version = 11 : i64} {
  func.func @_matmul_kernel(%arg0: i32, %arg1: i32, %arg2: i32, %arg3: memref<32x32xf32, #tpu.memory_space<vmem>>, %arg4: memref<32x96xf32, #tpu.memory_space<vmem>>, %arg5: memref<32x96xf32, #tpu.memory_space<vmem>>, %arg6: memref<32x96xf32, #tpu.memory_space<vmem>>) attributes {dimension_semantics = [#tpu.dimension_semantics<parallel>, #tpu.dimension_semantics<parallel>, #tpu.dimension_semantics<arbitrary>], iteration_bounds = array<i64: 1, 1, 1>, scalar_prefetch = 0 : i64, scratch_operands = 1 : i64, tpu.core_type = #tpu.core_type<tc>, window_params = [{transform_indices = @transform_0, window_bounds = array<i64: 32, 32>}, {transform_indices = @transform_1, window_bounds = array<i64: 32, 96>}, {transform_indices = @transform_2, window_bounds = array<i64: 32, 96>}]} {
    %c0_i32 = arith.constant 0 : i32
    %0 = arith.cmpi eq, %arg2, %c0_i32 : i32
    %1 = arith.extui %0 : i1 to i32
    %c0_i32_0 = arith.constant 0 : i32
    %2 = arith.cmpi ne, %1, %c0_i32_0 : i32
    scf.if %2 {
      %cst_10 = arith.constant 0.000000e+00 : f32
      %12 = vector.broadcast %cst_10 : f32 to vector<32x96xf32>
      %c0_11 = arith.constant 0 : index
      %c0_12 = arith.constant 0 : index
      %13 = vector.load %arg6[%c0_11, %c0_12] : memref<32x96xf32, #tpu.memory_space<vmem>>, vector<32x96xf32>
      tpu.vector_store %arg6[%c0_11, %c0_12], %12 {strides = array<i32>} : memref<32x96xf32, #tpu.memory_space<vmem>>, vector<32x96xf32>,
    } else {
    }
    %c0 = arith.constant 0 : index
    %c0_1 = arith.constant 0 : index
    %3 = vector.load %arg6[%c0, %c0_1] : memref<32x96xf32, #tpu.memory_space<vmem>>, vector<32x96xf32>
    %c0_2 = arith.constant 0 : index
    %c0_3 = arith.constant 0 : index
    %4 = vector.load %arg3[%c0_2, %c0_3] : memref<32x32xf32, #tpu.memory_space<vmem>>, vector<32x32xf32>
    %c0_4 = arith.constant 0 : index
    %c0_5 = arith.constant 0 : index
    %5 = vector.load %arg4[%c0_4, %c0_5] : memref<32x96xf32, #tpu.memory_space<vmem>>, vector<32x96xf32>
    %cst = arith.constant dense<0.000000e+00> : vector<32x96xf32>
    %6 = tpu.matmul %4, %5, %cst {dimension_numbers = #tpu.dot_dimension_numbers<[1], [0], [0], [1], [0, 0, 1, 1], [], []>} : vector<32x32xf32>, vector<32x96xf32>, vector<32x96xf32> -> vector<32x96xf32>
    %7 = arith.addf %3, %6 : vector<32x96xf32>
    %c0_6 = arith.constant 0 : index
    %c0_7 = arith.constant 0 : index
    %8 = vector.load %arg6[%c0_6, %c0_7] : memref<32x96xf32, #tpu.memory_space<vmem>>, vector<32x96xf32>
    tpu.vector_store %arg6[%c0_6, %c0_7], %7 {strides = array<i32>} : memref<32x96xf32, #tpu.memory_space<vmem>>, vector<32x96xf32>,
    %c0_i32_8 = arith.constant 0 : i32
    %9 = arith.cmpi eq, %arg2, %c0_i32_8 : i32
    %10 = arith.extui %9 : i1 to i32
    %c0_i32_9 = arith.constant 0 : i32
    %11 = arith.cmpi ne, %10, %c0_i32_9 : i32
    scf.if %11 {
      %c0_10 = arith.constant 0 : index
      %c0_11 = arith.constant 0 : index
      %12 = vector.load %arg6[%c0_10, %c0_11] : memref<32x96xf32, #tpu.memory_space<vmem>>, vector<32x96xf32>
      %c0_12 = arith.constant 0 : index
      %c0_13 = arith.constant 0 : index
      %13 = vector.load %arg5[%c0_12, %c0_13] : memref<32x96xf32, #tpu.memory_space<vmem>>, vector<32x96xf32>
      tpu.vector_store %arg5[%c0_12, %c0_13], %12 {strides = array<i32>} : memref<32x96xf32, #tpu.memory_space<vmem>>, vector<32x96xf32>,
    } else {
    }
    return
  }
  func.func @transform_0(%arg0: i32, %arg1: i32, %arg2: i32) -> (i32, i32) {
    %c0_i32 = arith.constant 0 : i32
    return %arg0, %arg2 : i32, i32
  }
  func.func @transform_1(%arg0: i32, %arg1: i32, %arg2: i32) -> (i32, i32) {
    %c0_i32 = arith.constant 0 : i32
    return %arg2, %arg1 : i32, i32
  }
  func.func @transform_2(%arg0: i32, %arg1: i32, %arg2: i32) -> (i32, i32) {
    %c0_i32 = arith.constant 0 : i32
    return %arg0, %arg1 : i32, i32
  }
}

</mosaic_0001>

<bundles_post_ra>
// kernel: tpu_custom_call.1
= control target key start
LH: loop header
LB: loop body
LE: loop exit
PB: predicated region body
PF: predicated region fallthrough
CT: control target
= control target key end

     0   :  { %7 = vsyncpa [#allocation4], 0  ;;  %s298_s0 = inlined_call_operand.hbm [shape: f32[32,32], index: 0, kind: input, shape index: {}]   ;;  %s299_s1 = inlined_call_operand.hbm [shape: f32[32,96], index: 1, kind: input, shape index: {}]   ;;  %s300_s2 = inlined_call_operand.hbm [shape: f32[32,96], index: 2, kind: output, shape index: {}]  }
   0x1   :  { %8 = vsyncpa [#allocation7], 0 }
   0x2   :  { %9 = vsyncpa [#allocation5], 0  ;;  %s14_s11 = sshll.u32 %s298_s0, 4  ;;  %s247_s12 = smov [#allocation3]   ;;  %s15_s11 = int_to_ptr.hbm [resolvable:$true] %s14_s11 }
   0x3   :  { %s16_s13 = sshll.u32 %s247_s12, 4  ;;  %s27_s16 = sshll.u32 %s299_s1, 4  ;;  %s17_s13 = int_to_ptr.vmem [resolvable:$true] %s16_s13  ;;  %s28_s16 = int_to_ptr.hbm [resolvable:$true] %s27_s16 }
   0x4   :  { %s248_s17 = smov 128   ;;  %s249_s18 = smov 8  }
   0x5   :  { %22 = dma.hbm_to_vmem [thread:$0]  %s15_s11, 512, %s17_s13, [#allocation4], %s248_s17, %s248_s17, %s249_s18  }
   0x6   :  { %s250_s19 = smov [#allocation6]  }
   0x7   :  { %s29_s20 = sshll.u32 %s250_s19, 4  ;;  %s30_s20 = int_to_ptr.vmem [resolvable:$true] %s29_s20 }
   0x8   :  { %35 = dma.hbm_to_vmem [thread:$0]  %s28_s16, 512, %s30_s20, [#allocation7], %s248_s17, %s248_s17, %s249_s18  }
   0x9   :  { %241 = dma.done.wait [#allocation4], 512  }
   0xa   :  { %242 = vsyncadd [#allocation4], 4294966784 }
   0xb   :  { %243 = dma.done.wait [#allocation7], 512  }
   0xc   :  { %244 = vsyncadd [#allocation7], 4294966784  ;;  %vm48_vm0 = vcmask 785408   ;;  %v251_v0 = vmov 0.0   ;;  %v64_v1 = vld [vmem:[#allocation6 + $0x18] sm:$0xff]  ;;  %v63_v2 = vld [vmem:[#allocation6 + $0x10] sm:$0xff] }
   0xd   :  { %49 = vst.msk [vmem:[#allocation2] sm:$0xff] %vm48_vm0, %v251_v0  ;;  %152 = vmatpush.msra.mxu2 %v64_v1  ;;  %153 = vmatpush.msra.mxu3 %v64_v1  ;;  %v62_v3 = vld [vmem:[#allocation6 + $0x8] sm:$0xff]  ;;  %v61_v4 = vld [vmem:[#allocation6] sm:$0xff]  ;;  %v59_v5 = vld [vmem:[#allocation3 + $0x10] sm:$0xff]  ;;  %vm65_vm1 = vcmask 261120   ;;  %s252_s0 = smov [#allocation8]  }
   0xe   :  { %50 = vst.msk [vmem:[#allocation2 + $0x8] sm:$0xff] %vm48_vm0, %v251_v0  ;;  %90 = vmatpush.msra.mxu0 %v64_v1  ;;  %151 = vmatpush.msra.mxu1 %v64_v1  ;;  %v60_v6 = vld [vmem:[#allocation3 + $0x18] sm:$0xff]  ;;  %v57_v7 = vld [vmem:[#allocation3] sm:$0xff]  ;;  %v58_v8 = vld [vmem:[#allocation3 + $0x8] sm:$0xff]  ;;  %s131_s1 = sshll.u32 %s252_s0, 4  ;;  %s133_s23 = sshll.u32 %s300_s2, 4  ;;  %s132_s1 = int_to_ptr.vmem [resolvable:$true] %s131_s1  ;;  %s134_s23 = int_to_ptr.hbm [resolvable:$true] %s133_s23 }
   0xf   :  { %51 = vst.msk [vmem:[#allocation2 + $0x10] sm:$0xff] %vm48_vm0, %v251_v0  ;;  %155 = vmatpush.msra.mxu2 %v63_v2  ;;  %156 = vmatpush.msra.mxu3 %v63_v2 }
  0x10   :  { %52 = vst.msk [vmem:[#allocation2 + $0x18] sm:$0xff] %vm48_vm0, %v251_v0  ;;  %91 = vmatpush.msra.mxu0 %v63_v2  ;;  %154 = vmatpush.msra.mxu1 %v63_v2 }
  0x11   :  { %158 = vmatpush.msra.mxu2 %v62_v3  ;;  %159 = vmatpush.msra.mxu3 %v62_v3 }
  0x12   :  { %92 = vmatpush.msra.mxu0 %v62_v3  ;;  %157 = vmatpush.msra.mxu1 %v62_v3 }
  0x13   :  { %161 = vmatpush.msra.mxu2 %v61_v4  ;;  %162 = vmatpush.msra.mxu3 %v61_v4 }
  0x14   :  { %149 = vmatmul.msk.f32.vlgmr.msra.gmra.mxu2 %vm65_vm1, %v59_v5  ;;  %150 = vmatmul.msk.f32.vlgmr.msra.gmra.mxu3 %vm65_vm1, %v60_v6  ;;  %v53_v9 = vld [vmem:[#allocation2] sm:$0xff] }
  0x15   :  { %93 = vmatpush.msra.mxu0 %v61_v4  ;;  %160 = vmatpush.msra.mxu1 %v61_v4  ;;  %v54_v10 = vld [vmem:[#allocation2 + $0x8] sm:$0xff] }
  0x16   :  { %147 = vmatmul.msk.f32.vlgmr.msra.gmra.mxu0 %vm65_vm1, %v57_v7  ;;  %148 = vmatmul.msk.f32.vlgmr.msra.gmra.mxu1 %vm65_vm1, %v58_v8  ;;  %v55_v15 = vld [vmem:[#allocation2 + $0x10] sm:$0xff] }
  0x17   :  { %v56_v16 = vld [vmem:[#allocation2 + $0x18] sm:$0xff] }
  0x93   :  { %v95_v11 = vpop.f32.mrf.mxu0  ;;  %v98_v12 = vpop.f32.mrf.mxu1 }
  0x94   :  { %v107_v13 = vadd.f32 %v95_v11, %v53_v9  ;;  %v108_v14 = vadd.f32 %v98_v12, %v54_v10 }
  0x96   :  { %112 = vst.msk [vmem:[#allocation2] sm:$0xff] %vm48_vm0, %v107_v13 }
  0x97   :  { %113 = vst.msk [vmem:[#allocation2 + $0x8] sm:$0xff] %vm48_vm0, %v108_v14  ;;  %v101_v17 = vpop.f32.mrf.mxu2  ;;  %v104_v18 = vpop.f32.mrf.mxu3 }
  0x98   :  { %v109_v19 = vadd.f32 %v101_v17, %v55_v15  ;;  %v110_v20 = vadd.f32 %v104_v18, %v56_v16 }
  0x9a   :  { %114 = vst.msk [vmem:[#allocation2 + $0x10] sm:$0xff] %vm48_vm0, %v109_v19 }
  0x9b   :  { %115 = vst.msk [vmem:[#allocation2 + $0x18] sm:$0xff] %vm48_vm0, %v110_v20 }
  0x9d   :  { %v119_v21 = vld [vmem:[#allocation2] sm:$0xff] }
  0x9e   :  { %v120_v22 = vld [vmem:[#allocation2 + $0x8] sm:$0xff]  ;;  %123 = vst.msk [vmem:[#allocation8] sm:$0xff] %vm48_vm0, %v119_v21 }
  0x9f   :  { %124 = vst.msk [vmem:[#allocation8 + $0x8] sm:$0xff] %vm48_vm0, %v120_v22 }
  0xa1   :  { %v121_v23 = vld [vmem:[#allocation2 + $0x10] sm:$0xff] }
  0xa2   :  { %v122_v24 = vld [vmem:[#allocation2 + $0x18] sm:$0xff]  ;;  %125 = vst.msk [vmem:[#allocation8 + $0x10] sm:$0xff] %vm48_vm0, %v121_v23 }
  0xa3   :  { %126 = vst.msk [vmem:[#allocation8 + $0x18] sm:$0xff] %vm48_vm0, %v122_v24 }
  0xa4   :  { %139 = dma.vmem_to_hbm [thread:$0]  %s132_s1, 512, %s134_s23, [#allocation5], %s248_s17, %s248_s17, %s249_s18  }
  0xa5   :  { %245 = dma.done.wait [#allocation5], 512  }
  0xa6   :  { %246 = vsyncadd [#allocation5], 4294966784 }
  0xa7   :  { %144 = vsyncpa [#allocation4], 1 }
  0xa8   :  { %145 = vsyncpa [#allocation7], 1 }
  0xa9   :  { %146 = vsyncpa [#allocation5], 1 }

</bundles_post_ra>
